<compile_context>
chip_gen: v6e
topology: v6e:2x2x1
jax: 0.10.0
libtpu: 0.0.40
codegen_flags: <defaults>
</compile_context>

<pallas_src>
import functools

import numpy as np
import jax
import jax.numpy as jnp
from jax.experimental import pallas as pl
from jax.experimental.pallas import tpu as pltpu


def _resize_kernel(x_ref, g_ref, o_ref):
    # x_ref: (TBC, H*W)    one (b, c) feature map per row, lane-dense
    # g_ref: (H*W, Hp*Wp)  constant one-hot gather matrix (single-buffered)
    # o_ref: (TBC, Hp*Wp)  flattened resized output
    o_ref[...] = jnp.dot(
        x_ref[...], g_ref[...], preferred_element_type=jnp.float32
    ).astype(o_ref.dtype)


def _nearest_indices(out_size: int, in_size: int) -> np.ndarray:
    # Exact integer form of floor(dst * in / out).
    idx = (np.arange(out_size, dtype=np.int64) * in_size) // out_size
    return np.clip(idx, 0, in_size - 1).astype(np.int32)


@functools.lru_cache(maxsize=None)
def _gather_matrix(H, W, Hp, Wp, dtype):
    """(H*W, Hp*Wp) one-hot G with G[src_flat[m], m] = 1, built via iota==src."""
    idx_h = _nearest_indices(Hp, H)
    idx_w = _nearest_indices(Wp, W)
    src = (idx_h[:, None] * W + idx_w[None, :]).reshape(-1)            # (Hp*Wp,)
    g = (np.arange(H * W, dtype=np.int64)[:, None] == src[None, :])
    return jnp.asarray(g.astype(np.float32), dtype=dtype)              # cached on device


def _row_tile(BC: int, itemsize: int):
    """Pick (rows per grid step, #grid steps): sublane-aligned, balanced,
    >= 2 steps whenever possible so v7x's two TensorCores both get work."""
    sublane = 8 * max(1, 4 // itemsize)     # 8 (f32), 16 (bf16), 32 (int8/fp8)
    tbc_max = 4096                          # ~4 MB f32 tile at HW=256: per-step
                                            # DMA time >> 0.35 us fixed overhead
    if BC < 2 * sublane:
        return BC, 1                        # too small to split; full-dim block
    n = max(2, pl.cdiv(BC, tbc_max))
    if n % 2:                               # even step count splits evenly on 2 TCs
        n += 1
    tbc = ((pl.cdiv(BC, n) + sublane - 1) // sublane) * sublane
    return tbc, pl.cdiv(BC, tbc)


def feature_resize(x: jnp.ndarray, size=(10, 25)) -> jnp.ndarray:
    """x: (B, C, H, W) -> (B, C, H'*W') via nearest-neighbor resize + flatten."""
    B, C, H, W = x.shape
    Hp, Wp = size
    HW, HWp = H * W, Hp * Wp
    BC = B * C

    orig_dtype = x.dtype
    if not jnp.issubdtype(orig_dtype, jnp.floating):
        x = x.astype(jnp.float32)           # MXU is float-only on v7x
    dtype = jnp.dtype(x.dtype)
    isz = dtype.itemsize

    G = _gather_matrix(H, W, Hp, Wp, dtype)
    x_flat = x.reshape(BC, HW)

    TBC, steps = _row_tile(BC, isz)

    # Real VMEM need (x/out double-buffered, G budgeted twice as margin) plus
    # headroom -- never a chip's whole physical VMEM.
    vmem_need = (2 * TBC * (HW + HWp) + 2 * HW * HWp) * isz
    vmem_limit = int(min(max(vmem_need + (4 << 20), 8 << 20), 32 << 20))

    out = pl.pallas_call(
        _resize_kernel,
        out_shape=jax.ShapeDtypeStruct((BC, HWp), dtype),
        grid_spec=pltpu.PrefetchScalarGridSpec(
            num_scalar_prefetch=0,
            grid=(steps,),
            in_specs=[
                # Streamed rows of x (double-buffered by the pipeline).
                pl.BlockSpec((TBC, HW), lambda i: (i, 0)),
                # Constant gather matrix: fetched once, single-buffered.
                pl.BlockSpec((HW, HWp), lambda i: (0, 0),
                             pipeline_mode=pl.Buffered(1)),
            ],
            # Partial last block: only valid rows are written back; OOB rows of
            # x_flat read in the ragged tile are discarded -- keep this invariant.
            out_specs=pl.BlockSpec((TBC, HWp), lambda i: (i, 0)),
        ),
        compiler_params=pltpu.CompilerParams(
            dimension_semantics=("parallel",),
            vmem_limit_bytes=vmem_limit,
        ),
        cost_estimate=pl.CostEstimate(
            flops=2 * BC * HW * HWp,
            bytes_accessed=(BC * (HW + HWp) + HW * HWp) * isz,
            transcendentals=0,
        ),
    )(x_flat, G)

    out = out.reshape(B, C, HWp)
    if out.dtype != orig_dtype:
        out = out.astype(orig_dtype)
    return out


if __name__ == "__main__":
    key = jax.random.PRNGKey(0)
    B, C, H, W = 2, 4, 16, 16
    size = (10, 25)
    x = jax.random.normal(key, (B, C, H, W), dtype=jnp.float32)

    out = jax.block_until_ready(feature_resize(x, size=size))
    assert out.shape == (B, C, size[0] * size[1]), out.shape

    # Reference: pure JAX nearest-neighbor resize + flatten.
    idx_h = _nearest_indices(size[0], H)
    idx_w = _nearest_indices(size[1], W)
    ref = x[:, :, idx_h, :][:, :, :, idx_w].reshape(B, C, -1)
    assert jnp.allclose(out, ref, atol=1e-5), "mismatch vs reference"

    print("KERNEL_OK")
</pallas_src>

<mosaic_0001>
module attributes {stable_mosaic.version = 11 : i64} {
  func.func @_resize_kernel(%arg0: i32, %arg1: memref<8x256xf32, #tpu.memory_space<vmem>>, %arg2: memref<256x250xf32, #tpu.memory_space<vmem>>, %arg3: memref<8x250xf32, #tpu.memory_space<vmem>>) attributes {dimension_semantics = [#tpu.dimension_semantics<parallel>], iteration_bounds = array<i64: 1>, scalar_prefetch = 0 : i64, scratch_operands = 0 : i64, tpu.core_type = #tpu.core_type<tc>, window_params = [{transform_indices = @transform_0, window_bounds = array<i64: 8, 256>}, {pipeline_mode = #tpu.pipeline_mode<synchronous>, transform_indices = @transform_1, window_bounds = array<i64: 256, 250>}, {transform_indices = @transform_2, window_bounds = array<i64: 8, 250>}]} {
    %c0 = arith.constant 0 : index
    %c0_0 = arith.constant 0 : index
    %0 = vector.load %arg1[%c0, %c0_0] : memref<8x256xf32, #tpu.memory_space<vmem>>, vector<8x256xf32>
    %c0_1 = arith.constant 0 : index
    %c0_2 = arith.constant 0 : index
    %1 = vector.load %arg2[%c0_1, %c0_2] : memref<256x250xf32, #tpu.memory_space<vmem>>, vector<256x250xf32>
    %cst = arith.constant dense<0.000000e+00> : vector<8x250xf32>
    %2 = tpu.matmul %0, %1, %cst {dimension_numbers = #tpu.dot_dimension_numbers<[1], [0], [0], [1], [0, 0, 1, 1], [], []>} : vector<8x256xf32>, vector<256x250xf32>, vector<8x250xf32> -> vector<8x250xf32>
    %c0_3 = arith.constant 0 : index
    %c0_4 = arith.constant 0 : index
    %3 = vector.load %arg3[%c0_3, %c0_4] : memref<8x250xf32, #tpu.memory_space<vmem>>, vector<8x250xf32>
    tpu.vector_store %arg3[%c0_3, %c0_4], %2 {strides = array<i32>} : memref<8x250xf32, #tpu.memory_space<vmem>>, vector<8x250xf32>,
    return
  }
  func.func @transform_0(%arg0: i32) -> (i32, i32) {
    %c0_i32 = arith.constant 0 : i32
    %c0_i32_0 = arith.constant 0 : i32
    return %arg0, %c0_i32 : i32, i32
  }
  func.func @transform_1(%arg0: i32) -> (i32, i32) {
    %c0_i32 = arith.constant 0 : i32
    %c0_i32_0 = arith.constant 0 : i32
    %c0_i32_1 = arith.constant 0 : i32
    return %c0_i32, %c0_i32_0 : i32, i32
  }
  func.func @transform_2(%arg0: i32) -> (i32, i32) {
    %c0_i32 = arith.constant 0 : i32
    %c0_i32_0 = arith.constant 0 : i32
    return %arg0, %c0_i32 : i32, i32
  }
}

</mosaic_0001>

<bundles_post_ra>
// kernel: tpu_custom_call.1
= control target key start
LH: loop header
LB: loop body
LE: loop exit
PB: predicated region body
PF: predicated region fallthrough
CT: control target
= control target key end

     0   :  { %7 = vsyncpa [#allocation3], 0  ;;  %s294_s0 = inlined_call_operand.hbm [shape: f32[8,256], index: 0, kind: input, shape index: {}]   ;;  %s295_s1 = inlined_call_operand.hbm [shape: f32[256,250], index: 1, kind: input, shape index: {}]   ;;  %s296_s2 = inlined_call_operand.hbm [shape: f32[8,250], index: 2, kind: output, shape index: {}]  }
   0x1   :  { %8 = vsyncpa [#allocation6], 0 }
   0x2   :  { %9 = vsyncpa [#allocation4], 0  ;;  %s265_s9 = smov [#allocation2]   ;;  %s266_s11 = smov [#allocation5]  }
   0x3   :  { %s16_s10 = sshll.u32 %s265_s9, 4  ;;  %s25_s12 = sshll.u32 %s266_s11, 4  ;;  %s17_s10 = int_to_ptr.vmem [resolvable:$true] %s16_s10  ;;  %s26_s12 = int_to_ptr.vmem [resolvable:$true] %s25_s12 }
   0x4   :  { %s207_s13 = scalar_lea.vmem %s17_s10, 256  ;;  %p212_p1 = scmp.lt.s32.totalorder %s17_s10, %s17_s10 }
   0x5   :  { %p208_p0 = scmp.ne.s32.totalorder %s17_s10, %s207_s13  ;;  %p213_p2 = scmp.lt.s32.totalorder %s207_s13, %s207_s13 }
   0x7   :  { %p214_p3 = por %p213_p2, %p212_p1 }
   0x9   :  { %p215_p4 = pnand %p214_p3, %p208_p0 }
   0xb   :  { %218 = shalt.err (!%p215_p4)
}
   0xc   :  { %19 = dma.hbm_to_vmem [thread:$0]  %s294_s0, 256, %s17_s10, [#allocation3]  }
   0xd   :  { %s227_s16 = scalar_lea.vmem %s26_s12, 8192  ;;  %p232_p6 = scmp.lt.s32.totalorder %s26_s12, %s26_s12 }
   0xe   :  { %p228_p5 = scmp.ne.s32.totalorder %s26_s12, %s227_s16  ;;  %p233_p7 = scmp.lt.s32.totalorder %s227_s16, %s227_s16 }
  0x10   :  { %p234_p8 = por %p233_p7, %p232_p6 }
  0x12   :  { %p235_p9 = pnand %p234_p8, %p228_p5 }
  0x14   :  { %238 = shalt.err (!%p235_p9)
}
  0x15   :  { %s267_s17 = smov 256   ;;  %s268_s18 = smov 16  }
  0x16   :  { %31 = dma.hbm_to_vmem [thread:$0]  %s295_s1, 8192, %s26_s12, [#allocation6], %s267_s17, %s267_s17, %s268_s18  }
  0x17   :  { %259 = dma.done.wait [#allocation3], 256  }
  0x18   :  { %260 = vsyncadd [#allocation3], 4294967040 }
  0x19   :  { %261 = dma.done.wait [#allocation6], 8192  }
  0x1a   :  { %262 = vsyncadd [#allocation6], 4294959104  ;;  %v71_v0 = vld [vmem:[#allocation5 + $0xf8] sm:$0xff]  ;;  %v70_v1 = vld [vmem:[#allocation5 + $0xf0] sm:$0xff]  ;;  %s269_s0 = smov [#allocation7]   ;;  %vm176_vm0 = vcmask 998400  }
  0x1b   :  { %v69_v2 = vld [vmem:[#allocation5 + $0xe8] sm:$0xff]  ;;  %104 = vmatprep.subr.mxu0 %v71_v0  ;;  %v68_v3 = vld [vmem:[#allocation5 + $0xe0] sm:$0xff]  ;;  %v67_v4 = vld [vmem:[#allocation5 + $0xd8] sm:$0xff]  ;;  %s184_s1 = sshll.u32 %s269_s0, 4  ;;  %s185_s1 = int_to_ptr.vmem [resolvable:$true] %s184_s1 }
  0x1c   :  { %105 = vmatpush1.msra.mxu0 %v70_v1  ;;  %v66_v5 = vld [vmem:[#allocation5 + $0xd0] sm:$0xff]  ;;  %v65_v6 = vld [vmem:[#allocation5 + $0xc8] sm:$0xff]  ;;  %v64_v7 = vld [vmem:[#allocation5 + $0xc0] sm:$0xff]  ;;  %s239_s21 = scalar_lea.vmem %s185_s1, 256  ;;  %p244_p11 = scmp.lt.s32.totalorder %s185_s1, %s185_s1 }
  0x1d   :  { %106 = vmatprep.subr.mxu0 %v69_v2  ;;  %v63_v8 = vld [vmem:[#allocation5 + $0xb8] sm:$0xff]  ;;  %v62_v9 = vld [vmem:[#allocation5 + $0xb0] sm:$0xff]  ;;  %v61_v10 = vld [vmem:[#allocation5 + $0xa8] sm:$0xff]  ;;  %p240_p10 = scmp.ne.s32.totalorder %s185_s1, %s239_s21  ;;  %p245_p12 = scmp.lt.s32.totalorder %s239_s21, %s239_s21 }
  0x1e   :  { %107 = vmatpush1.msra.mxu0 %v68_v3  ;;  %v60_v11 = vld [vmem:[#allocation5 + $0xa0] sm:$0xff]  ;;  %v59_v12 = vld [vmem:[#allocation5 + $0x98] sm:$0xff]  ;;  %v58_v13 = vld [vmem:[#allocation5 + $0x90] sm:$0xff] }
  0x1f   :  { %108 = vmatprep.subr.mxu0 %v67_v4  ;;  %v57_v14 = vld [vmem:[#allocation5 + $0x88] sm:$0xff]  ;;  %v56_v15 = vld [vmem:[#allocation5 + $0x80] sm:$0xff]  ;;  %v55_v16 = vld [vmem:[#allocation5 + $0x78] sm:$0xff]  ;;  %p246_p13 = por %p245_p12, %p244_p11 }
  0x20   :  { %109 = vmatpush1.msra.mxu0 %v66_v5  ;;  %v54_v17 = vld [vmem:[#allocation5 + $0x70] sm:$0xff]  ;;  %v53_v18 = vld [vmem:[#allocation5 + $0x68] sm:$0xff]  ;;  %v52_v19 = vld [vmem:[#allocation5 + $0x60] sm:$0xff] }
  0x21   :  { %110 = vmatprep.subr.mxu0 %v65_v6  ;;  %v51_v20 = vld [vmem:[#allocation5 + $0x58] sm:$0xff]  ;;  %v50_v21 = vld [vmem:[#allocation5 + $0x50] sm:$0xff]  ;;  %v49_v22 = vld [vmem:[#allocation5 + $0x48] sm:$0xff]  ;;  %p247_p0 = pnand %p246_p13, %p240_p10 }
  0x22   :  { %111 = vmatpush1.msra.mxu0 %v64_v7  ;;  %v48_v23 = vld [vmem:[#allocation5 + $0x40] sm:$0xff]  ;;  %v39_v24 = vld [vmem:[#allocation2 + $0x8] sm:$0xff]  ;;  %v46_v26 = vld [vmem:[#allocation5 + $0x30] sm:$0xff] }
  0x23   :  { %112 = vmatprep.subr.mxu0 %v63_v8  ;;  %v47_v25 = vld [vmem:[#allocation5 + $0x38] sm:$0xff]  ;;  %168 = vmatprep.mubr.f32.mxu0 %v39_v24  ;;  %v45_v27 = vld [vmem:[#allocation5 + $0x28] sm:$0xff]  ;;  %v44_v28 = vld [vmem:[#allocation5 + $0x20] sm:$0xff] }
  0x24   :  { %113 = vmatpush1.msra.mxu0 %v62_v9  ;;  %v43_v29 = vld [vmem:[#allocation5 + $0x18] sm:$0xff]  ;;  %v42_v30 = vld [vmem:[#allocation5 + $0x10] sm:$0xff]  ;;  %v41_v31 = vld [vmem:[#allocation5 + $0x8] sm:$0xff] }
  0x25   :  { %114 = vmatprep.subr.mxu0 %v61_v10  ;;  %v40_v32 = vld [vmem:[#allocation5] sm:$0xff]  ;;  %v103_v33 = vld [vmem:[#allocation5 + $0x1f8] sm:$0xff]  ;;  %v102_v34 = vld [vmem:[#allocation5 + $0x1f0] sm:$0xff] }
  0x26   :  { %115 = vmatpush1.msra.mxu0 %v60_v11  ;;  %v101_v35 = vld [vmem:[#allocation5 + $0x1e8] sm:$0xff]  ;;  %v100_v36 = vld [vmem:[#allocation5 + $0x1e0] sm:$0xff]  ;;  %v99_v37 = vld [vmem:[#allocation5 + $0x1d8] sm:$0xff] }
  0x27   :  { %116 = vmatprep.subr.mxu0 %v59_v12  ;;  %v98_v38 = vld [vmem:[#allocation5 + $0x1d0] sm:$0xff]  ;;  %v97_v39 = vld [vmem:[#allocation5 + $0x1c8] sm:$0xff]  ;;  %v96_v40 = vld [vmem:[#allocation5 + $0x1c0] sm:$0xff] }
  0x28   :  { %117 = vmatpush1.msra.mxu0 %v58_v13  ;;  %v95_v41 = vld [vmem:[#allocation5 + $0x1b8] sm:$0xff]  ;;  %v94_v42 = vld [vmem:[#allocation5 + $0x1b0] sm:$0xff]  ;;  %v93_v43 = vld [vmem:[#allocation5 + $0x1a8] sm:$0xff] }
  0x29   :  { %118 = vmatprep.subr.mxu0 %v57_v14  ;;  %v92_v44 = vld [vmem:[#allocation5 + $0x1a0] sm:$0xff]  ;;  %v91_v45 = vld [vmem:[#allocation5 + $0x198] sm:$0xff]  ;;  %v90_v46 = vld [vmem:[#allocation5 + $0x190] sm:$0xff] }
  0x2a   :  { %119 = vmatpush1.msra.mxu0 %v56_v15  ;;  %v89_v47 = vld [vmem:[#allocation5 + $0x188] sm:$0xff]  ;;  %v88_v48 = vld [vmem:[#allocation5 + $0x180] sm:$0xff]  ;;  %v87_v49 = vld [vmem:[#allocation5 + $0x178] sm:$0xff] }
  0x2b   :  { %120 = vmatprep.subr.mxu0 %v55_v16  ;;  %v86_v50 = vld [vmem:[#allocation5 + $0x170] sm:$0xff]  ;;  %v85_v51 = vld [vmem:[#allocation5 + $0x168] sm:$0xff]  ;;  %v84_v52 = vld [vmem:[#allocation5 + $0x160] sm:$0xff] }
  0x2c   :  { %121 = vmatpush1.msra.mxu0 %v54_v17  ;;  %v83_v53 = vld [vmem:[#allocation5 + $0x158] sm:$0xff]  ;;  %v82_v54 = vld [vmem:[#allocation5 + $0x150] sm:$0xff]  ;;  %v81_v55 = vld [vmem:[#allocation5 + $0x148] sm:$0xff] }
  0x2d   :  { %122 = vmatprep.subr.mxu0 %v53_v18  ;;  %v80_v56 = vld [vmem:[#allocation5 + $0x140] sm:$0xff]  ;;  %v79_v57 = vld [vmem:[#allocation5 + $0x138] sm:$0xff]  ;;  %v78_v58 = vld [vmem:[#allocation5 + $0x130] sm:$0xff] }
  0x2e   :  { %123 = vmatpush1.msra.mxu0 %v52_v19  ;;  %v77_v59 = vld [vmem:[#allocation5 + $0x128] sm:$0xff]  ;;  %v76_v60 = vld [vmem:[#allocation5 + $0x120] sm:$0xff]  ;;  %v75_v61 = vld [vmem:[#allocation5 + $0x118] sm:$0xff] }
  0x2f   :  { %124 = vmatprep.subr.mxu0 %v51_v20  ;;  %v74_v62 = vld [vmem:[#allocation5 + $0x110] sm:$0xff]  ;;  %v73_v63 = vld [vmem:[#allocation5 + $0x108] sm:$0xff]  ;;  %v72_v0 = vld [vmem:[#allocation5 + $0x100] sm:$0xff] }
  0x30   :  { %125 = vmatpush1.msra.mxu0 %v50_v21  ;;  %v38_v1 = vld [vmem:[#allocation2] sm:$0xff] }
  0x31   :  { %126 = vmatprep.subr.mxu0 %v49_v22 }
  0x32   :  { %127 = vmatpush1.msra.mxu0 %v48_v23 }
  0x33   :  { %128 = vmatprep.subr.mxu0 %v47_v25 }
  0x34   :  { %129 = vmatpush1.msra.mxu0 %v46_v26 }
  0x35   :  { %130 = vmatprep.subr.mxu0 %v45_v27 }
  0x36   :  { %131 = vmatpush1.msra.mxu0 %v44_v28 }
  0x37   :  { %132 = vmatprep.subr.mxu0 %v43_v29 }
  0x38   :  { %133 = vmatpush1.msra.mxu0 %v42_v30 }
  0x39   :  { %134 = vmatprep.subr.mxu0 %v41_v31 }
  0x3a   :  { %135 = vmatpush1.msra.mxu0 %v40_v32 }
  0x3b   :  { %136 = vmatprep.subr.mxu0 %v103_v33 }
  0x3c   :  { %137 = vmatpush2.msra.mxu0 %v102_v34 }
  0x3d   :  { %138 = vmatprep.subr.mxu0 %v101_v35 }
  0x3e   :  { %139 = vmatpush2.msra.mxu0 %v100_v36 }
  0x3f   :  { %140 = vmatprep.subr.mxu0 %v99_v37 }
  0x40   :  { %141 = vmatpush2.msra.mxu0 %v98_v38 }
  0x41   :  { %142 = vmatprep.subr.mxu0 %v97_v39 }
  0x42   :  { %143 = vmatpush2.msra.mxu0 %v96_v40 }
  0x43   :  { %144 = vmatprep.subr.mxu0 %v95_v41 }
  0x44   :  { %145 = vmatpush2.msra.mxu0 %v94_v42 }
  0x45   :  { %146 = vmatprep.subr.mxu0 %v93_v43 }
  0x46   :  { %147 = vmatpush2.msra.mxu0 %v92_v44 }
  0x47   :  { %148 = vmatprep.subr.mxu0 %v91_v45 }
  0x48   :  { %149 = vmatpush2.msra.mxu0 %v90_v46 }
  0x49   :  { %150 = vmatprep.subr.mxu0 %v89_v47 }
  0x4a   :  { %151 = vmatpush2.msra.mxu0 %v88_v48 }
  0x4b   :  { %152 = vmatprep.subr.mxu0 %v87_v49 }
  0x4c   :  { %153 = vmatpush2.msra.mxu0 %v86_v50 }
  0x4d   :  { %154 = vmatprep.subr.mxu0 %v85_v51 }
  0x4e   :  { %155 = vmatpush2.msra.mxu0 %v84_v52 }
  0x4f   :  { %156 = vmatprep.subr.mxu0 %v83_v53 }
  0x50   :  { %157 = vmatpush2.msra.mxu0 %v82_v54 }
  0x51   :  { %158 = vmatprep.subr.mxu0 %v81_v55 }
  0x52   :  { %159 = vmatpush2.msra.mxu0 %v80_v56 }
  0x53   :  { %160 = vmatprep.subr.mxu0 %v79_v57 }
  0x54   :  { %161 = vmatpush2.msra.mxu0 %v78_v58 }
  0x55   :  { %162 = vmatprep.subr.mxu0 %v77_v59 }
  0x56   :  { %163 = vmatpush2.msra.mxu0 %v76_v60 }
  0x57   :  { %164 = vmatprep.subr.mxu0 %v75_v61 }
  0x58   :  { %165 = vmatpush2.msra.mxu0 %v74_v62 }
  0x59   :  { %166 = vmatprep.subr.mxu0 %v73_v63 }
  0x5a   :  { %167 = vmatpush2.msra.mxu0 %v72_v0 }
  0x5b   :  { %169 = vmatmul.mubr.f32.vlgmr.msra.gmra.mxu0 %v38_v1 }
 0x11b   :  { %v170_v2 = vpop.f32.mrf.mxu0 }
 0x11c   :  { %175 = vst [vmem:[#allocation7] sm:$0xff] %v170_v2 }
 0x11d   :  { %v172_v3 = vpop.f32.mrf.mxu0 }
 0x11e   :  { %177 = vst.msk [vmem:[#allocation7 + $0x8] sm:$0xff] %vm176_vm0, %v172_v3 }
 0x11f   :  { %250 = shalt.err (!%p247_p0)
}
 0x120   :  { %187 = dma.vmem_to_hbm [thread:$0]  %s185_s1, 256, %s296_s2, [#allocation4]  }
 0x121   :  { %263 = dma.done.wait [#allocation4], 256  }
 0x122   :  { %264 = vsyncadd [#allocation4], 4294967040 }
 0x123   :  { %191 = vsyncpa [#allocation3], 1 }
 0x124   :  { %192 = vsyncpa [#allocation6], 1 }
 0x125   :  { %193 = vsyncpa [#allocation4], 1 }

</bundles_post_ra>
